<compile_context>
chip_gen: v7x
topology: tpu7x:2x2x1
jax: 0.10.0
libtpu: 0.0.40
codegen_flags: <defaults>
</compile_context>

<pallas_src>
import functools

import jax
import jax.numpy as jnp
from jax.experimental import pallas as pl
from jax.experimental.pallas import tpu as pltpu

INPUT_DIM = 40
HIDDEN_DIM = 128
REP_DIM = 16
GROUPS = 128 // REP_DIM          # 8 output rows packed into one 128-lane slab row
DEFAULT_BATCH_TILE = 4096        # fits comfortably in VMEM on v5e/v6e/v7x


def _round_up(n: int, m: int) -> int:
    return ((n + m - 1) // m) * m


def _deep_svdd_kernel(x_ref, w1_ref, b1_ref, w2big_ref, b2big_ref, o_ref, h_ref):
    # x_ref:     (TB, 40)          bf16   batch tile
    # w1_ref:    (40, 128)         bf16   resident
    # b1_ref:    (1, 128)          f32    resident
    # w2big_ref: (8, 128, 128)     bf16   w2big[s, :, 16s:16(s+1)] = W2, zero elsewhere
    # b2big_ref: (1, 128)          f32    b2 tiled 8x along lanes
    # o_ref:     (TB//8, 128)      f32    lane-dense output slab
    # h_ref:     (TB, 128)         f32    VMEM scratch for hidden activations

    # Layer 1: bf16 matmul, f32 accumulation; bias + ReLU in f32.
    h = jnp.dot(x_ref[...], w1_ref[...], preferred_element_type=jnp.float32)
    h_ref[...] = jnp.maximum(h + b1_ref[...], 0.0)

    # Layer 2, written directly into the lane-dense slab: slab row g holds the
    # 16-wide outputs of batch rows 8g .. 8g+7 concatenated along lanes.
    rows = o_ref.shape[0]                                  # TB // 8
    o_ref[...] = jnp.broadcast_to(b2big_ref[...], o_ref.shape)
    for s in range(GROUPS):                                # static unroll (8)
        # hidden rows s, s+8, s+16, ... : strided sublane load from VMEM scratch
        hs = h_ref[pl.ds(s, rows, stride=GROUPS), :].astype(w2big_ref.dtype)
        # w2big[s] routes these rows' 16 outputs to lanes [16*s, 16*(s+1)).
        o_ref[...] += jnp.dot(hs, w2big_ref[s], preferred_element_type=jnp.float32)


@functools.partial(jax.jit, static_argnames=("batch_tile",))
def deep_svdd_forward(x, w1, b1, w2, b2, *, batch_tile=DEFAULT_BATCH_TILE):
    """relu(x @ w1 + b1) @ w2 + b2, x: (B, 40) -> (B, 16) float32."""
    B = x.shape[0]
    assert x.shape[1] == INPUT_DIM
    assert w1.shape == (INPUT_DIM, HIDDEN_DIM)
    assert w2.shape == (HIDDEN_DIM, REP_DIM)

    # ---- batch tile / padding ------------------------------------------------
    if B <= batch_tile:
        tb = _round_up(max(B, 1), GROUPS)      # single grid step
        b_pad = tb
    else:
        assert batch_tile % (8 * GROUPS) == 0  # keep (8,128) tiling of out slab
        tb = batch_tile
        b_pad = _round_up(B, tb)
    num_tiles = b_pad // tb
    tile_rows = tb // GROUPS
    slab_rows = b_pad // GROUPS

    # ---- wrapper-side dtype / layout prep (cheap XLA ops) --------------------
    x_bf = x.astype(jnp.bfloat16)
    if b_pad != B:
        x_bf = jnp.pad(x_bf, ((0, b_pad - B), (0, 0)))
    w1_bf = w1.astype(jnp.bfloat16)
    b1_f = jnp.asarray(b1, jnp.float32).reshape(1, HIDDEN_DIM)
    w2_f = jnp.asarray(w2, jnp.float32)
    w2big = jnp.zeros((GROUPS, HIDDEN_DIM, GROUPS * REP_DIM), jnp.float32)
    for s in range(GROUPS):
        w2big = w2big.at[s, :, s * REP_DIM:(s + 1) * REP_DIM].set(w2_f)
    w2big_bf = w2big.astype(jnp.bfloat16)
    b2big = jnp.tile(jnp.asarray(b2, jnp.float32).reshape(1, REP_DIM), (1, GROUPS))

    flops = 2 * b_pad * (INPUT_DIM * HIDDEN_DIM + HIDDEN_DIM * GROUPS * REP_DIM)
    bytes_accessed = (x_bf.size * 2 + w1_bf.size * 2 + w2big_bf.size * 2
                      + b1_f.size * 4 + b2big.size * 4 + b_pad * REP_DIM * 4)

    out_slab = pl.pallas_call(
        _deep_svdd_kernel,
        out_shape=jax.ShapeDtypeStruct((slab_rows, GROUPS * REP_DIM), jnp.float32),
        grid_spec=pltpu.PrefetchScalarGridSpec(
            num_scalar_prefetch=0,
            grid=(num_tiles,),
            in_specs=[
                pl.BlockSpec((tb, INPUT_DIM), lambda i: (i, 0)),           # x: batch-tiled
                pl.BlockSpec((INPUT_DIM, HIDDEN_DIM), lambda i: (0, 0)),   # params: resident
                pl.BlockSpec((1, HIDDEN_DIM), lambda i: (0, 0)),
                pl.BlockSpec((GROUPS, HIDDEN_DIM, GROUPS * REP_DIM),
                             lambda i: (0, 0, 0)),
                pl.BlockSpec((1, GROUPS * REP_DIM), lambda i: (0, 0)),
            ],
            out_specs=pl.BlockSpec((tile_rows, GROUPS * REP_DIM), lambda i: (i, 0)),
            scratch_shapes=[pltpu.VMEM((tb, HIDDEN_DIM), jnp.float32)],
        ),
        compiler_params=pltpu.CompilerParams(
            dimension_semantics=("parallel",),    # batch tiles are independent
        ),
        cost_estimate=pl.CostEstimate(
            flops=int(flops), transcendentals=0, bytes_accessed=int(bytes_accessed)),
    )(x_bf, w1_bf, b1_f, w2big_bf, b2big)

    # (b_pad//8, 128) f32 is bit-identical, row-major, to (b_pad, 16).
    out = out_slab.reshape(b_pad, REP_DIM)
    return out[:B] if b_pad != B else out


def _init_params(key):
    """Deterministic synthetic parameters matching nn.Linear shapes
    (stored as (in, out); biases kept 2-D (1, out))."""
    k1, k2, k3, k4 = jax.random.split(key, 4)
    s1 = 1.0 / jnp.sqrt(float(INPUT_DIM))
    s2 = 1.0 / jnp.sqrt(float(HIDDEN_DIM))
    w1 = jax.random.uniform(k1, (INPUT_DIM, HIDDEN_DIM), jnp.float32, -s1, s1)
    b1 = jax.random.uniform(k2, (1, HIDDEN_DIM), jnp.float32, -s1, s1)
    w2 = jax.random.uniform(k3, (HIDDEN_DIM, REP_DIM), jnp.float32, -s2, s2)
    b2 = jax.random.uniform(k4, (1, REP_DIM), jnp.float32, -s2, s2)
    return w1, b1, w2, b2


if __name__ == "__main__":
    key = jax.random.PRNGKey(0)
    k_x, k_p = jax.random.split(key)
    w1, b1, w2, b2 = _init_params(k_p)

    # Primary small test (exercises batch padding 37 -> 40, single tile).
    B = 37
    x = jax.random.normal(k_x, (B, INPUT_DIM), dtype=jnp.float32)
    out = jax.block_until_ready(deep_svdd_forward(x, w1, b1, w2, b2))
    ref = jnp.maximum(x @ w1 + b1, 0.0) @ w2 + b2
    assert out.shape == (B, REP_DIM)
    assert jnp.allclose(out, ref, atol=3e-2, rtol=3e-2), \
        float(jnp.max(jnp.abs(out - ref)))

    # Multi-tile path (3 batch tiles of 128 rows, padded 300 -> 384).
    B2 = 300
    x2 = jax.random.normal(jax.random.PRNGKey(1), (B2, INPUT_DIM), dtype=jnp.float32)
    out2 = jax.block_until_ready(
        deep_svdd_forward(x2, w1, b1, w2, b2, batch_tile=128))
    ref2 = jnp.maximum(x2 @ w1 + b1, 0.0) @ w2 + b2
    assert out2.shape == (B2, REP_DIM)
    assert jnp.allclose(out2, ref2, atol=3e-2, rtol=3e-2), \
        float(jnp.max(jnp.abs(out2 - ref2)))

    print("KERNEL_OK")
</pallas_src>

<mosaic_0001>
module attributes {stable_mosaic.version = 11 : i64} {
  func.func @_deep_svdd_kernel(%arg0: i32, %arg1: memref<40x40xbf16, #tpu.memory_space<vmem>>, %arg2: memref<40x128xbf16, #tpu.memory_space<vmem>>, %arg3: memref<1x128xf32, #tpu.memory_space<vmem>>, %arg4: memref<8x128x128xbf16, #tpu.memory_space<vmem>>, %arg5: memref<1x128xf32, #tpu.memory_space<vmem>>, %arg6: memref<5x128xf32, #tpu.memory_space<vmem>>, %arg7: memref<40x128xf32, #tpu.memory_space<vmem>>) attributes {dimension_semantics = [#tpu.dimension_semantics<parallel>], iteration_bounds = array<i64: 1>, scalar_prefetch = 0 : i64, scratch_operands = 1 : i64, tpu.core_type = #tpu.core_type<tc>, window_params = [{transform_indices = @transform_0, window_bounds = array<i64: 40, 40>}, {pipeline_mode = #tpu.pipeline_mode<synchronous>, transform_indices = @transform_1, window_bounds = array<i64: 40, 128>}, {pipeline_mode = #tpu.pipeline_mode<synchronous>, transform_indices = @transform_2, window_bounds = array<i64: 1, 128>}, {pipeline_mode = #tpu.pipeline_mode<synchronous>, transform_indices = @transform_3, window_bounds = array<i64: 8, 128, 128>}, {pipeline_mode = #tpu.pipeline_mode<synchronous>, transform_indices = @transform_4, window_bounds = array<i64: 1, 128>}, {transform_indices = @transform_5, window_bounds = array<i64: 5, 128>}]} {
    %c0 = arith.constant 0 : index
    %c0_0 = arith.constant 0 : index
    %0 = vector.load %arg1[%c0, %c0_0] : memref<40x40xbf16, #tpu.memory_space<vmem>>, vector<40x40xbf16>
    %c0_1 = arith.constant 0 : index
    %c0_2 = arith.constant 0 : index
    %1 = vector.load %arg2[%c0_1, %c0_2] : memref<40x128xbf16, #tpu.memory_space<vmem>>, vector<40x128xbf16>
    %cst = arith.constant dense<0.000000e+00> : vector<40x128xf32>
    %2 = tpu.matmul %0, %1, %cst {dimension_numbers = #tpu.dot_dimension_numbers<[1], [0], [0], [1], [0, 0, 1, 1], [], []>} : vector<40x40xbf16>, vector<40x128xbf16>, vector<40x128xf32> -> vector<40x128xf32>
    %c0_3 = arith.constant 0 : index
    %c0_4 = arith.constant 0 : index
    %3 = vector.load %arg3[%c0_3, %c0_4] : memref<1x128xf32, #tpu.memory_space<vmem>>, vector<1x128xf32>
    %4 = vector.broadcast %3 : vector<1x128xf32> to vector<40x128xf32>
    %5 = arith.addf %2, %4 : vector<40x128xf32>
    %cst_5 = arith.constant 0.000000e+00 : f32
    %6 = vector.broadcast %cst_5 : f32 to vector<40x128xf32>
    %7 = arith.maximumf %5, %6 : vector<40x128xf32>
    %c0_6 = arith.constant 0 : index
    %c0_7 = arith.constant 0 : index
    %8 = vector.load %arg7[%c0_6, %c0_7] : memref<40x128xf32, #tpu.memory_space<vmem>>, vector<40x128xf32>
    tpu.vector_store %arg7[%c0_6, %c0_7], %7 {strides = array<i32>} : memref<40x128xf32, #tpu.memory_space<vmem>>, vector<40x128xf32>,
    %c0_8 = arith.constant 0 : index
    %c0_9 = arith.constant 0 : index
    %9 = vector.load %arg5[%c0_8, %c0_9] : memref<1x128xf32, #tpu.memory_space<vmem>>, vector<1x128xf32>
    %10 = vector.shape_cast %9 : vector<1x128xf32> to vector<1x128xf32>
    %11 = vector.broadcast %10 : vector<1x128xf32> to vector<5x128xf32>
    %c0_10 = arith.constant 0 : index
    %c0_11 = arith.constant 0 : index
    %12 = vector.load %arg6[%c0_10, %c0_11] : memref<5x128xf32, #tpu.memory_space<vmem>>, vector<5x128xf32>
    tpu.vector_store %arg6[%c0_10, %c0_11], %11 {strides = array<i32>} : memref<5x128xf32, #tpu.memory_space<vmem>>, vector<5x128xf32>,
    %c0_12 = arith.constant 0 : index
    %c0_13 = arith.constant 0 : index
    %13 = tpu.strided_load %arg7[%c0_12, %c0_13] {strides = array<i32: 8, 1>} : memref<40x128xf32, #tpu.memory_space<vmem>>, vector<5x128xf32>
    %14 = arith.truncf %13 : vector<5x128xf32> to vector<5x128xbf16>
    %c0_14 = arith.constant 0 : index
    %c0_15 = arith.constant 0 : index
    %15 = vector.load %arg6[%c0_14, %c0_15] : memref<5x128xf32, #tpu.memory_space<vmem>>, vector<5x128xf32>
    %c0_16 = arith.constant 0 : index
    %c0_17 = arith.constant 0 : index
    %c0_18 = arith.constant 0 : index
    %16 = vector.load %arg4[%c0_16, %c0_17, %c0_18] : memref<8x128x128xbf16, #tpu.memory_space<vmem>>, vector<1x128x128xbf16>
    %17 = vector.shape_cast %16 : vector<1x128x128xbf16> to vector<128x128xbf16>
    %cst_19 = arith.constant dense<0.000000e+00> : vector<5x128xf32>
    %18 = tpu.matmul %14, %17, %cst_19 {dimension_numbers = #tpu.dot_dimension_numbers<[1], [0], [0], [1], [0, 0, 1, 1], [], []>} : vector<5x128xbf16>, vector<128x128xbf16>, vector<5x128xf32> -> vector<5x128xf32>
    %19 = arith.addf %15, %18 : vector<5x128xf32>
    %c0_20 = arith.constant 0 : index
    %c0_21 = arith.constant 0 : index
    %20 = vector.load %arg6[%c0_20, %c0_21] : memref<5x128xf32, #tpu.memory_space<vmem>>, vector<5x128xf32>
    tpu.vector_store %arg6[%c0_20, %c0_21], %19 {strides = array<i32>} : memref<5x128xf32, #tpu.memory_space<vmem>>, vector<5x128xf32>,
    %c1 = arith.constant 1 : index
    %c0_22 = arith.constant 0 : index
    %21 = tpu.strided_load %arg7[%c1, %c0_22] {strides = array<i32: 8, 1>} : memref<40x128xf32, #tpu.memory_space<vmem>>, vector<5x128xf32>
    %22 = arith.truncf %21 : vector<5x128xf32> to vector<5x128xbf16>
    %c0_23 = arith.constant 0 : index
    %c0_24 = arith.constant 0 : index
    %23 = vector.load %arg6[%c0_23, %c0_24] : memref<5x128xf32, #tpu.memory_space<vmem>>, vector<5x128xf32>
    %c1_25 = arith.constant 1 : index
    %c0_26 = arith.constant 0 : index
    %c0_27 = arith.constant 0 : index
    %24 = vector.load %arg4[%c1_25, %c0_26, %c0_27] : memref<8x128x128xbf16, #tpu.memory_space<vmem>>, vector<1x128x128xbf16>
    %25 = vector.shape_cast %24 : vector<1x128x128xbf16> to vector<128x128xbf16>
    %cst_28 = arith.constant dense<0.000000e+00> : vector<5x128xf32>
    %26 = tpu.matmul %22, %25, %cst_28 {dimension_numbers = #tpu.dot_dimension_numbers<[1], [0], [0], [1], [0, 0, 1, 1], [], []>} : vector<5x128xbf16>, vector<128x128xbf16>, vector<5x128xf32> -> vector<5x128xf32>
    %27 = arith.addf %23, %26 : vector<5x128xf32>
    %c0_29 = arith.constant 0 : index
    %c0_30 = arith.constant 0 : index
    %28 = vector.load %arg6[%c0_29, %c0_30] : memref<5x128xf32, #tpu.memory_space<vmem>>, vector<5x128xf32>
    tpu.vector_store %arg6[%c0_29, %c0_30], %27 {strides = array<i32>} : memref<5x128xf32, #tpu.memory_space<vmem>>, vector<5x128xf32>,
    %c2 = arith.constant 2 : index
    %c0_31 = arith.constant 0 : index
    %29 = tpu.strided_load %arg7[%c2, %c0_31] {strides = array<i32: 8, 1>} : memref<40x128xf32, #tpu.memory_space<vmem>>, vector<5x128xf32>
    %30 = arith.truncf %29 : vector<5x128xf32> to vector<5x128xbf16>
    %c0_32 = arith.constant 0 : index
    %c0_33 = arith.constant 0 : index
    %31 = vector.load %arg6[%c0_32, %c0_33] : memref<5x128xf32, #tpu.memory_space<vmem>>, vector<5x128xf32>
    %c2_34 = arith.constant 2 : index
    %c0_35 = arith.constant 0 : index
    %c0_36 = arith.constant 0 : index
    %32 = vector.load %arg4[%c2_34, %c0_35, %c0_36] : memref<8x128x128xbf16, #tpu.memory_space<vmem>>, vector<1x128x128xbf16>
    %33 = vector.shape_cast %32 : vector<1x128x128xbf16> to vector<128x128xbf16>
    %cst_37 = arith.constant dense<0.000000e+00> : vector<5x128xf32>
    %34 = tpu.matmul %30, %33, %cst_37 {dimension_numbers = #tpu.dot_dimension_numbers<[1], [0], [0], [1], [0, 0, 1, 1], [], []>} : vector<5x128xbf16>, vector<128x128xbf16>, vector<5x128xf32> -> vector<5x128xf32>
    %35 = arith.addf %31, %34 : vector<5x128xf32>
    %c0_38 = arith.constant 0 : index
    %c0_39 = arith.constant 0 : index
    %36 = vector.load %arg6[%c0_38, %c0_39] : memref<5x128xf32, #tpu.memory_space<vmem>>, vector<5x128xf32>
    tpu.vector_store %arg6[%c0_38, %c0_39], %35 {strides = array<i32>} : memref<5x128xf32, #tpu.memory_space<vmem>>, vector<5x128xf32>,
    %c3 = arith.constant 3 : index
    %c0_40 = arith.constant 0 : index
    %37 = tpu.strided_load %arg7[%c3, %c0_40] {strides = array<i32: 8, 1>} : memref<40x128xf32, #tpu.memory_space<vmem>>, vector<5x128xf32>
    %38 = arith.truncf %37 : vector<5x128xf32> to vector<5x128xbf16>
    %c0_41 = arith.constant 0 : index
    %c0_42 = arith.constant 0 : index
    %39 = vector.load %arg6[%c0_41, %c0_42] : memref<5x128xf32, #tpu.memory_space<vmem>>, vector<5x128xf32>
    %c3_43 = arith.constant 3 : index
    %c0_44 = arith.constant 0 : index
    %c0_45 = arith.constant 0 : index
    %40 = vector.load %arg4[%c3_43, %c0_44, %c0_45] : memref<8x128x128xbf16, #tpu.memory_space<vmem>>, vector<1x128x128xbf16>
    %41 = vector.shape_cast %40 : vector<1x128x128xbf16> to vector<128x128xbf16>
    %cst_46 = arith.constant dense<0.000000e+00> : vector<5x128xf32>
    %42 = tpu.matmul %38, %41, %cst_46 {dimension_numbers = #tpu.dot_dimension_numbers<[1], [0], [0], [1], [0, 0, 1, 1], [], []>} : vector<5x128xbf16>, vector<128x128xbf16>, vector<5x128xf32> -> vector<5x128xf32>
    %43 = arith.addf %39, %42 : vector<5x128xf32>
    %c0_47 = arith.constant 0 : index
    %c0_48 = arith.constant 0 : index
    %44 = vector.load %arg6[%c0_47, %c0_48] : memref<5x128xf32, #tpu.memory_space<vmem>>, vector<5x128xf32>
    tpu.vector_store %arg6[%c0_47, %c0_48], %43 {strides = array<i32>} : memref<5x128xf32, #tpu.memory_space<vmem>>, vector<5x128xf32>,
    %c4 = arith.constant 4 : index
    %c0_49 = arith.constant 0 : index
    %45 = tpu.strided_load %arg7[%c4, %c0_49] {strides = array<i32: 8, 1>} : memref<40x128xf32, #tpu.memory_space<vmem>>, vector<5x128xf32>
    %46 = arith.truncf %45 : vector<5x128xf32> to vector<5x128xbf16>
    %c0_50 = arith.constant 0 : index
    %c0_51 = arith.constant 0 : index
    %47 = vector.load %arg6[%c0_50, %c0_51] : memref<5x128xf32, #tpu.memory_space<vmem>>, vector<5x128xf32>
    %c4_52 = arith.constant 4 : index
    %c0_53 = arith.constant 0 : index
    %c0_54 = arith.constant 0 : index
    %48 = vector.load %arg4[%c4_52, %c0_53, %c0_54] : memref<8x128x128xbf16, #tpu.memory_space<vmem>>, vector<1x128x128xbf16>
    %49 = vector.shape_cast %48 : vector<1x128x128xbf16> to vector<128x128xbf16>
    %cst_55 = arith.constant dense<0.000000e+00> : vector<5x128xf32>
    %50 = tpu.matmul %46, %49, %cst_55 {dimension_numbers = #tpu.dot_dimension_numbers<[1], [0], [0], [1], [0, 0, 1, 1], [], []>} : vector<5x128xbf16>, vector<128x128xbf16>, vector<5x128xf32> -> vector<5x128xf32>
    %51 = arith.addf %47, %50 : vector<5x128xf32>
    %c0_56 = arith.constant 0 : index
    %c0_57 = arith.constant 0 : index
    %52 = vector.load %arg6[%c0_56, %c0_57] : memref<5x128xf32, #tpu.memory_space<vmem>>, vector<5x128xf32>
    tpu.vector_store %arg6[%c0_56, %c0_57], %51 {strides = array<i32>} : memref<5x128xf32, #tpu.memory_space<vmem>>, vector<5x128xf32>,
    %c5 = arith.constant 5 : index
    %c0_58 = arith.constant 0 : index
    %53 = tpu.strided_load %arg7[%c5, %c0_58] {strides = array<i32: 8, 1>} : memref<40x128xf32, #tpu.memory_space<vmem>>, vector<5x128xf32>
    %54 = arith.truncf %53 : vector<5x128xf32> to vector<5x128xbf16>
    %c0_59 = arith.constant 0 : index
    %c0_60 = arith.constant 0 : index
    %55 = vector.load %arg6[%c0_59, %c0_60] : memref<5x128xf32, #tpu.memory_space<vmem>>, vector<5x128xf32>
    %c5_61 = arith.constant 5 : index
    %c0_62 = arith.constant 0 : index
    %c0_63 = arith.constant 0 : index
    %56 = vector.load %arg4[%c5_61, %c0_62, %c0_63] : memref<8x128x128xbf16, #tpu.memory_space<vmem>>, vector<1x128x128xbf16>
    %57 = vector.shape_cast %56 : vector<1x128x128xbf16> to vector<128x128xbf16>
    %cst_64 = arith.constant dense<0.000000e+00> : vector<5x128xf32>
    %58 = tpu.matmul %54, %57, %cst_64 {dimension_numbers = #tpu.dot_dimension_numbers<[1], [0], [0], [1], [0, 0, 1, 1], [], []>} : vector<5x128xbf16>, vector<128x128xbf16>, vector<5x128xf32> -> vector<5x128xf32>
    %59 = arith.addf %55, %58 : vector<5x128xf32>
    %c0_65 = arith.constant 0 : index
    %c0_66 = arith.constant 0 : index
    %60 = vector.load %arg6[%c0_65, %c0_66] : memref<5x128xf32, #tpu.memory_space<vmem>>, vector<5x128xf32>
    tpu.vector_store %arg6[%c0_65, %c0_66], %59 {strides = array<i32>} : memref<5x128xf32, #tpu.memory_space<vmem>>, vector<5x128xf32>,
    %c6 = arith.constant 6 : index
    %c0_67 = arith.constant 0 : index
    %61 = tpu.strided_load %arg7[%c6, %c0_67] {strides = array<i32: 8, 1>} : memref<40x128xf32, #tpu.memory_space<vmem>>, vector<5x128xf32>
    %62 = arith.truncf %61 : vector<5x128xf32> to vector<5x128xbf16>
    %c0_68 = arith.constant 0 : index
    %c0_69 = arith.constant 0 : index
    %63 = vector.load %arg6[%c0_68, %c0_69] : memref<5x128xf32, #tpu.memory_space<vmem>>, vector<5x128xf32>
    %c6_70 = arith.constant 6 : index
    %c0_71 = arith.constant 0 : index
    %c0_72 = arith.constant 0 : index
    %64 = vector.load %arg4[%c6_70, %c0_71, %c0_72] : memref<8x128x128xbf16, #tpu.memory_space<vmem>>, vector<1x128x128xbf16>
    %65 = vector.shape_cast %64 : vector<1x128x128xbf16> to vector<128x128xbf16>
    %cst_73 = arith.constant dense<0.000000e+00> : vector<5x128xf32>
    %66 = tpu.matmul %62, %65, %cst_73 {dimension_numbers = #tpu.dot_dimension_numbers<[1], [0], [0], [1], [0, 0, 1, 1], [], []>} : vector<5x128xbf16>, vector<128x128xbf16>, vector<5x128xf32> -> vector<5x128xf32>
    %67 = arith.addf %63, %66 : vector<5x128xf32>
    %c0_74 = arith.constant 0 : index
    %c0_75 = arith.constant 0 : index
    %68 = vector.load %arg6[%c0_74, %c0_75] : memref<5x128xf32, #tpu.memory_space<vmem>>, vector<5x128xf32>
    tpu.vector_store %arg6[%c0_74, %c0_75], %67 {strides = array<i32>} : memref<5x128xf32, #tpu.memory_space<vmem>>, vector<5x128xf32>,
    %c7 = arith.constant 7 : index
    %c0_76 = arith.constant 0 : index
    %69 = tpu.strided_load %arg7[%c7, %c0_76] {strides = array<i32: 8, 1>} : memref<40x128xf32, #tpu.memory_space<vmem>>, vector<5x128xf32>
    %70 = arith.truncf %69 : vector<5x128xf32> to vector<5x128xbf16>
    %c0_77 = arith.constant 0 : index
    %c0_78 = arith.constant 0 : index
    %71 = vector.load %arg6[%c0_77, %c0_78] : memref<5x128xf32, #tpu.memory_space<vmem>>, vector<5x128xf32>
    %c7_79 = arith.constant 7 : index
    %c0_80 = arith.constant 0 : index
    %c0_81 = arith.constant 0 : index
    %72 = vector.load %arg4[%c7_79, %c0_80, %c0_81] : memref<8x128x128xbf16, #tpu.memory_space<vmem>>, vector<1x128x128xbf16>
    %73 = vector.shape_cast %72 : vector<1x128x128xbf16> to vector<128x128xbf16>
    %cst_82 = arith.constant dense<0.000000e+00> : vector<5x128xf32>
    %74 = tpu.matmul %70, %73, %cst_82 {dimension_numbers = #tpu.dot_dimension_numbers<[1], [0], [0], [1], [0, 0, 1, 1], [], []>} : vector<5x128xbf16>, vector<128x128xbf16>, vector<5x128xf32> -> vector<5x128xf32>
    %75 = arith.addf %71, %74 : vector<5x128xf32>
    %c0_83 = arith.constant 0 : index
    %c0_84 = arith.constant 0 : index
    %76 = vector.load %arg6[%c0_83, %c0_84] : memref<5x128xf32, #tpu.memory_space<vmem>>, vector<5x128xf32>
    tpu.vector_store %arg6[%c0_83, %c0_84], %75 {strides = array<i32>} : memref<5x128xf32, #tpu.memory_space<vmem>>, vector<5x128xf32>,
    return
  }
  func.func @transform_0(%arg0: i32) -> (i32, i32) {
    %c0_i32 = arith.constant 0 : i32
    %c0_i32_0 = arith.constant 0 : i32
    return %arg0, %c0_i32 : i32, i32
  }
  func.func @transform_1(%arg0: i32) -> (i32, i32) {
    %c0_i32 = arith.constant 0 : i32
    %c0_i32_0 = arith.constant 0 : i32
    %c0_i32_1 = arith.constant 0 : i32
    return %c0_i32, %c0_i32_0 : i32, i32
  }
  func.func @transform_2(%arg0: i32) -> (i32, i32) {
    %c0_i32 = arith.constant 0 : i32
    %c0_i32_0 = arith.constant 0 : i32
    %c0_i32_1 = arith.constant 0 : i32
    return %c0_i32, %c0_i32_0 : i32, i32
  }
  func.func @transform_3(%arg0: i32) -> (i32, i32, i32) {
    %c0_i32 = arith.constant 0 : i32
    %c0_i32_0 = arith.constant 0 : i32
    %c0_i32_1 = arith.constant 0 : i32
    %c0_i32_2 = arith.constant 0 : i32
    return %c0_i32, %c0_i32_0, %c0_i32_1 : i32, i32, i32
  }
  func.func @transform_4(%arg0: i32) -> (i32, i32) {
    %c0_i32 = arith.constant 0 : i32
    %c0_i32_0 = arith.constant 0 : i32
    %c0_i32_1 = arith.constant 0 : i32
    return %c0_i32, %c0_i32_0 : i32, i32
  }
  func.func @transform_5(%arg0: i32) -> (i32, i32) {
    %c0_i32 = arith.constant 0 : i32
    %c0_i32_0 = arith.constant 0 : i32
    return %arg0, %c0_i32 : i32, i32
  }
}

</mosaic_0001>

<bundles_post_ra>
// kernel: deep_svdd_forward.1
= control target key start
LH: loop header
LB: loop body
LE: loop exit
PB: predicated region body
PF: predicated region fallthrough
CT: control target
= control target key end

     0   :  { %v1575_v0 = vmov 0.0   ;;  %vm1576_vm0 = vmmov 0   ;;  %vm76_vm1 = vcmask 1043456   ;;  %vm66_vm2 = vcmask 326656   ;;  %s1963_s1 = inlined_call_operand.vmem [shape: bf16[40,128], index: 1, kind: input, shape index: {}]   ;;  %s1964_s0 = inlined_call_operand.vmem [shape: bf16[40,40], index: 0, kind: input, shape index: {}]   ;;  %s1965_s3 = inlined_call_operand.vmem [shape: bf16[8,128,128], index: 3, kind: input, shape index: {}]   ;;  %s1966_s2 = inlined_call_operand.vmem [shape: f32[1,128], index: 2, kind: input, shape index: {}]   ;;  %s1967_s4 = inlined_call_operand.vmem [shape: f32[1,128], index: 4, kind: input, shape index: {}]   ;;  %s1968_s5 = inlined_call_operand.vmem [shape: f32[5,128], index: 5, kind: output, shape index: {}]  }
   0x1   :  { %1325 = vmatprep.subr.bf16.mxu0 %v1575_v0  ;;  %v1505_v1 = vld [vmem:[%s1963_s1] sm:$0xff]   ;;  %1331 = vmatprep.mubr.msk.bf16.mxu0 %vm1576_vm0, %v1575_v0  ;;  %v1506_v2 = vld [vmem:[%s1963_s1 + $0x8] sm:$0xff]   ;;  %v1507_v3 = vld [vmem:[%s1963_s1 + $0x10] ss:$0 sps:$4 sm:$0xff]  }
   0x2   :  { %1343 = vmatprep.subr.bf16.mxu1 %v1575_v0  ;;  %1359 = vmatprep.mubr.msk.bf16.mxu1 %vm1576_vm0, %v1575_v0  ;;  %v78_v4 = vsel %vm76_vm1, %v1507_v3, 0  ;;  %v1508_v5 = vld [vmem:[%s1964_s0] sm:$0xff]   ;;  %v1509_v6 = vld [vmem:[%s1964_s0 + $0x8] sm:$0xff]   ;;  %v1510_v7 = vld [vmem:[%s1964_s0 + $0x10] ss:$0 sps:$4 sm:$0xff]  }
   0x3   :  { %1326 = vmatpush3.bf16.msra.mxu0 %v1505_v1  ;;  %v1511_v8 = vld [vmem:[%s1965_s3] sm:$0xff]   ;;  %v1513_v10 = vld [vmem:[%s1965_s3 + $0x8] sm:$0xff]   ;;  %v1515_v12 = vld [vmem:[%s1965_s3 + $0x10] sm:$0xff]  }
   0x4   :  { %1327 = vmatprep.subr.bf16.mxu0 %v1575_v0  ;;  %v1512_v9 = vld [vmem:[%s1965_s3 + $0x40] sm:$0xff]   ;;  %1344 = vmatpush3.bf16.msra.mxu1 %v1511_v8  ;;  %v1514_v11 = vld [vmem:[%s1965_s3 + $0x48] sm:$0xff]   ;;  %v1516_v13 = vld [vmem:[%s1965_s3 + $0x50] sm:$0xff]  }
   0x5   :  { %1345 = vmatprep.subr.bf16.mxu1 %v1575_v0  ;;  %v1517_v14 = vld [vmem:[%s1965_s3 + $0x18] sm:$0xff]   ;;  %v1519_v16 = vld [vmem:[%s1965_s3 + $0x20] sm:$0xff]   ;;  %v1521_v18 = vld [vmem:[%s1965_s3 + $0x28] sm:$0xff]  }
   0x6   :  { %v1518_v15 = vld [vmem:[%s1965_s3 + $0x58] sm:$0xff]   ;;  %v1520_v17 = vld [vmem:[%s1965_s3 + $0x60] sm:$0xff]   ;;  %v1522_v19 = vld [vmem:[%s1965_s3 + $0x68] sm:$0xff]  }
   0x7   :  { %1328 = vmatpush3.bf16.msra.mxu0 %v1506_v2  ;;  %v1523_v20 = vld [vmem:[%s1965_s3 + $0x30] sm:$0xff]   ;;  %v1525_v22 = vld [vmem:[%s1965_s3 + $0x38] sm:$0xff]   ;;  %v1060_v24 = vld [vmem:[%s1966_s2] ss:$0 sm:$0xff] }
   0x8   :  { %1329 = vmatprep.subr.bf16.mxu0 %v1575_v0  ;;  %1346 = vmatpush3.bf16.msra.mxu1 %v1513_v10  ;;  %v1524_v21 = vld [vmem:[%s1965_s3 + $0x70] sm:$0xff]   ;;  %v1526_v23 = vld [vmem:[%s1965_s3 + $0x78] sm:$0xff]   ;;  %v1070_v29 = vld [vmem:[%s1967_s4] ss:$0 sm:$0xff] }
   0x9   :  { %1347 = vmatprep.subr.bf16.mxu1 %v1575_v0  ;;  %153 = vst [vmem:[%s1968_s5] sm:$0x1f] %v1070_v29  ;;  %v1527_v54 = vld [vmem:[%s1965_s3 + $0x80] sm:$0xff]   ;;  %v1529_v58 = vld [vmem:[%s1965_s3 + $0x88] sm:$0xff]   ;;  %v1531_v60 = vld [vmem:[%s1965_s3 + $0x90] sm:$0xff]  }
   0xa   :  { %v1528_v55 = vld [vmem:[%s1965_s3 + $0xc0] sm:$0xff]   ;;  %v1530_v59 = vld [vmem:[%s1965_s3 + $0xc8] sm:$0xff]   ;;  %v1532_v61 = vld [vmem:[%s1965_s3 + $0xd0] sm:$0xff]  }
   0xb   :  { %1330 = vmatpush3.bf16.msra.mxu0 %v78_v4  ;;  %v1533_v62 = vld [vmem:[%s1965_s3 + $0x98] sm:$0xff]   ;;  %v1535_v1 = vld [vmem:[%s1965_s3 + $0xa0] sm:$0xff]   ;;  %v1537_v3 = vld [vmem:[%s1965_s3 + $0xa8] sm:$0xff]  }
   0xc   :  { %1363 = vmatprep.subr.bf16.mxu0 %v1575_v0  ;;  %1348 = vmatpush3.bf16.msra.mxu1 %v1515_v12  ;;  %v1534_v63 = vld [vmem:[%s1965_s3 + $0xd8] sm:$0xff]   ;;  %v1536_v2 = vld [vmem:[%s1965_s3 + $0xe0] sm:$0xff]   ;;  %v1538_v4 = vld [vmem:[%s1965_s3 + $0xe8] sm:$0xff]  }
   0xd   :  { %1349 = vmatprep.subr.bf16.mxu1 %v1575_v0  ;;  %v1542_v10 = vld [vmem:[%s1965_s3 + $0xf8] sm:$0xff]   ;;  %v1555_v29 = vld [vmem:[%s1965_s3 + $0x130] sm:$0xff]  }
   0xe   :  { %1332 = vmatmul.mubr.msk.bf16.vlgmr.msra.gmra.mrb[0].mxu0 %vm66_vm2, %v1508_v5  ;;  %v1539_v5 = vld [vmem:[%s1965_s3 + $0xb0] sm:$0xff]  }
   0xf   :  { %1335 = vmatprep.mubr.msk.bf16.mxu0 %vm1576_vm0, %v1575_v0  ;;  %1364 = vmatpush3.bf16.msra.mxu0 %v1512_v9  ;;  %v1541_v9 = vld [vmem:[%s1965_s3 + $0xb8] sm:$0xff]  }
  0x10   :  { %1365 = vmatprep.subr.bf16.mxu0 %v1575_v0  ;;  %1350 = vmatpush3.bf16.msra.mxu1 %v1517_v14 }
  0x11   :  { %1351 = vmatprep.subr.bf16.mxu1 %v1575_v0 }
  0x13   :  { %1366 = vmatpush3.bf16.msra.mxu0 %v1514_v11 }
  0x14   :  { %1367 = vmatprep.subr.bf16.mxu0 %v1575_v0  ;;  %1352 = vmatpush3.bf16.msra.mxu1 %v1519_v16  ;;  %v1544_v16 = vld [vmem:[%s1965_s3 + $0x140] sm:$0xff]  }
  0x15   :  { %1353 = vmatprep.subr.bf16.mxu1 %v1575_v0 }
  0x16   :  { %1336 = vmatmul.mubr.msk.bf16.gmra.mrb[4].mxu0 %vm66_vm2, %v1509_v6  ;;  %v1540_v6 = vld [vmem:[%s1965_s3 + $0xf0] sm:$0xff]  }
  0x17   :  { %1339 = vmatprep.mubr.msk.bf16.mxu0 %vm1576_vm0, %v1575_v0  ;;  %1368 = vmatpush3.bf16.msra.mxu0 %v1516_v13 }
  0x18   :  { %1369 = vmatprep.subr.bf16.mxu0 %v1575_v0  ;;  %1354 = vmatpush3.bf16.msra.mxu1 %v1521_v18 }
  0x19   :  { %1355 = vmatprep.subr.bf16.mxu1 %v1575_v0 }
  0x1b   :  { %1370 = vmatpush3.bf16.msra.mxu0 %v1518_v15  ;;  %v1543_v15 = vld [vmem:[%s1965_s3 + $0x100] sm:$0xff]  }
  0x1c   :  { %1371 = vmatprep.subr.bf16.mxu0 %v1575_v0  ;;  %1356 = vmatpush3.bf16.msra.mxu1 %v1523_v20  ;;  %v1546_v20 = vld [vmem:[%s1965_s3 + $0x148] sm:$0xff]  }
  0x1d   :  { %1357 = vmatprep.subr.bf16.mxu1 %v1575_v0 }
  0x1e   :  { %1340 = vmatmul.mubr.msk.bf16.gmra.mrb[8].mxu0 %vm66_vm2, %v1510_v7 }
  0x1f   :  { %1379 = vmatprep.mubr.msk.bf16.mxu0 %vm1576_vm0, %v1575_v0  ;;  %1372 = vmatpush3.bf16.msra.mxu0 %v1520_v17 }
  0x20   :  { %1373 = vmatprep.subr.bf16.mxu0 %v1575_v0  ;;  %1358 = vmatpush3.bf16.msra.mxu1 %v1525_v22  ;;  %v1548_v22 = vld [vmem:[%s1965_s3 + $0x150] sm:$0xff]  }
  0x21   :  { %1383 = vmatprep.subr.bf16.mxu1 %v1575_v0 }
  0x23   :  { %1374 = vmatpush3.bf16.msra.mxu0 %v1522_v19  ;;  %v1545_v19 = vld [vmem:[%s1965_s3 + $0x108] sm:$0xff]  }
  0x24   :  { %1375 = vmatprep.subr.bf16.mxu0 %v1575_v0 }
  0x27   :  { %1376 = vmatpush3.bf16.msra.mxu0 %v1524_v21  ;;  %v1547_v21 = vld [vmem:[%s1965_s3 + $0x110] sm:$0xff]  }
  0x28   :  { %1377 = vmatprep.subr.bf16.mxu0 %v1575_v0 }
  0x2b   :  { %1378 = vmatpush3.bf16.msra.mxu0 %v1526_v23  ;;  %v1549_v23 = vld [vmem:[%s1965_s3 + $0x118] sm:$0xff]  }
  0x2c   :  { %1403 = vmatprep.subr.bf16.mxu0 %v1575_v0 }
  0xe1   :  { %v114_v25 = vpop.f32.mrb[0].mxu0 }
  0xe2   :  { %v115_v26 = vadd.f32 %v1060_v24, %v114_v25  ;;  %v1333_v27 = vpop.f32.mrb[1].mxu0  ;;  %v1551_v25 = vld [vmem:[%s1965_s3 + $0x120] sm:$0xff]  }
  0xe3   :  { %v117_v28 = vpop.f32.mrb[2].mxu0  ;;  %v1553_v27 = vld [vmem:[%s1965_s3 + $0x128] sm:$0xff]  }
  0xe4   :  { %v136_v30 = vmax.f32 %v115_v26, 0.0  ;;  %v118_v31 = vadd.f32 %v1060_v24, %v117_v28  ;;  %v1334_v32 = vpop.f32.mrb[3].mxu0  ;;  %v1552_v26 = vld [vmem:[%s1965_s3 + $0x160] sm:$0xff]   ;;  %v1554_v28 = vld [vmem:[%s1965_s3 + $0x168] sm:$0xff]  }
  0xe6   :  { %141 = vst [vmem:[#allocation2] sm:$0xff] %v136_v30  ;;  %v137_v33 = vmax.f32 %v118_v31, 0.0  ;;  %v1556_v30 = vld [vmem:[%s1965_s3 + $0x170] sm:$0xff]  }
  0xe8   :  { %142 = vst [vmem:[#allocation2 + $0x8] sm:$0xff] %v137_v33  ;;  %v1557_v33 = vld [vmem:[%s1965_s3 + $0x138] sm:$0xff]  }
  0xe9   :  { %v122_v34 = vpop.f32.mrb[4].mxu0 }
  0xea   :  { %v123_v35 = vadd.f32 %v1060_v24, %v122_v34  ;;  %v1337_v36 = vpop.f32.mrb[5].mxu0  ;;  %v1558_v34 = vld [vmem:[%s1965_s3 + $0x178] sm:$0xff]  }
  0xeb   :  { %v125_v37 = vpop.f32.mrb[6].mxu0 }
  0xec   :  { %v138_v38 = vmax.f32 %v123_v35, 0.0  ;;  %v126_v39 = vadd.f32 %v1060_v24, %v125_v37  ;;  %v1338_v40 = vpop.f32.mrb[7].mxu0 }
  0xed   :  { %v1560_v40 = vld [vmem:[%s1965_s3 + $0x1c0] sm:$0xff]  }
  0xee   :  { %143 = vst [vmem:[#allocation2 + $0x10] sm:$0xff] %v138_v38  ;;  %v139_v41 = vmax.f32 %v126_v39, 0.0  ;;  %v1559_v39 = vld [vmem:[%s1965_s3 + $0x180] sm:$0xff]  }
  0xf0   :  { %144 = vst [vmem:[#allocation2 + $0x18] sm:$0xff] %v139_v41 }
  0xf1   :  { %v130_v42 = vpop.f32.mrb[8].mxu0 }
  0xf2   :  { %v131_v43 = vadd.f32 %v1060_v24, %v130_v42  ;;  %v1341_v44 = vpop.f32.mrb[9].mxu0  ;;  %v1550_v24 = vld [vmem:[%s1965_s3 + $0x158] sm:$0xff]  }
  0xf3   :  { %v133_v45 = vpop.f32.mrb[10].mxu0  ;;  %v1562_v44 = vld [vmem:[%s1965_s3 + $0x1c8] sm:$0xff]  }
  0xf4   :  { %v140_v46 = vmax.f32 %v131_v43, 0.0  ;;  %v1342_v47 = vpop.f32.mrb[11].mxu0  ;;  %v1561_v43 = vld [vmem:[%s1965_s3 + $0x188] sm:$0xff]   ;;  %v1563_v45 = vld [vmem:[%s1965_s3 + $0x190] sm:$0xff]  }
  0xf5   :  { %v1565_v47 = vld [vmem:[%s1965_s3 + $0x198] sm:$0xff]  }
  0xf6   :  { %145 = vst [vmem:[#allocation2 + $0x20] sm:$0xff] %v140_v46  ;;  %v1564_v46 = vld [vmem:[%s1965_s3 + $0x1d0] sm:$0xff]  }
  0xf7   :  { %v154_v48 = vld [vmem:[#allocation2] ss:$8 sm:$0xf]  ;;  %v266_v49 = vld [vmem:[#allocation2 + $0x1] ss:$8 sm:$0xf] }
  0xf8   :  { %v379_v11 = vld [vmem:[#allocation2 + $0x2] ss:$8 sm:$0xf]  ;;  %v492_v12 = vld [vmem:[#allocation2 + $0x3] ss:$8 sm:$0xf] }
  0xf9   :  { %v605_v35 = vld [vmem:[#allocation2 + $0x4] ss:$8 sm:$0xf]  ;;  %v718_v36 = vld [vmem:[#allocation2 + $0x5] ss:$8 sm:$0xf] }
  0xfd   :  { %v155_v50 = vld [vmem:[#allocation2] ss:$8 sm:$0x10]  ;;  %v267_v51 = vld [vmem:[#allocation2 + $0x1] ss:$8 sm:$0x10] }
  0xfe   :  { %v156_v52 = vor.u32 %v155_v50, %v154_v48  ;;  %v268_v53 = vor.u32 %v267_v51, %v266_v49  ;;  %v380_v7 = vld [vmem:[#allocation2 + $0x2] ss:$8 sm:$0x10]  ;;  %v493_v8 = vld [vmem:[#allocation2 + $0x3] ss:$8 sm:$0x10] }
  0xff   :  { %v381_v13 = vor.u32 %v380_v7, %v379_v11  ;;  %v494_v14 = vor.u32 %v493_v8, %v492_v12  ;;  %v606_v31 = vld [vmem:[#allocation2 + $0x4] ss:$8 sm:$0x10]  ;;  %v719_v32 = vld [vmem:[#allocation2 + $0x5] ss:$8 sm:$0x10] }
 0x100   :  { %v157_v56 = vpack.c.bf16 %v156_v52, %v156_v52  ;;  %v269_v57 = vpack.c.bf16 %v268_v53, %v268_v53  ;;  %v607_v37 = vor.u32 %v606_v31, %v605_v35  ;;  %v720_v38 = vor.u32 %v719_v32, %v718_v36  ;;  %v1566_v48 = vld [vmem:[%s1965_s3 + $0x1d8] sm:$0xff]   ;;  %v1567_v49 = vld [vmem:[%s1965_s3 + $0x1a0] sm:$0xff]   ;;  %v1569_v51 = vld [vmem:[%s1965_s3 + $0x1a8] sm:$0xff]  }
 0x101   :  { %v382_v17 = vpack.c.bf16 %v381_v13, %v381_v13  ;;  %v495_v18 = vpack.c.bf16 %v494_v14, %v494_v14  ;;  %v1568_v50 = vld [vmem:[%s1965_s3 + $0x1e0] sm:$0xff]   ;;  %v1570_v52 = vld [vmem:[%s1965_s3 + $0x1e8] sm:$0xff]   ;;  %v1571_v53 = vld [vmem:[%s1965_s3 + $0x1b0] sm:$0xff]  }
 0x102   :  { %1360 = vmatmul.mubr.bf16.vlgmr.msra.gmra.mrb[0].mxu1 %v157_v56  ;;  %1380 = vmatmul.mubr.bf16.vlgmr.msra.gmra.mrb[12].mxu0 %v269_v57  ;;  %v608_v41 = vpack.c.bf16 %v607_v37, %v607_v37  ;;  %v721_v42 = vpack.c.bf16 %v720_v38, %v720_v38  ;;  %v945_v56 = vld [vmem:[#allocation2 + $0x7] ss:$8 sm:$0x10]  ;;  %v1573_v57 = vld [vmem:[%s1965_s3 + $0x1b8] sm:$0xff]  }
 0x103   :  { %1384 = vmatpush3.bf16.msra.mxu1 %v1527_v54  ;;  %1404 = vmatpush3.bf16.msra.mxu0 %v1528_v55  ;;  %v1572_v54 = vld [vmem:[%s1965_s3 + $0x1f0] sm:$0xff]   ;;  %v832_v55 = vld [vmem:[#allocation2 + $0x6] ss:$8 sm:$0x10] }
 0x104   :  { %1385 = vmatprep.subr.bf16.mxu1 %v1575_v0  ;;  %1405 = vmatprep.subr.bf16.mxu0 %v1575_v0 }
 0x105   :  { %1399 = vmatprep.mubr.msk.bf16.mxu1 %vm1576_vm0, %v1575_v0  ;;  %1419 = vmatprep.mubr.msk.bf16.mxu0 %vm1576_vm0, %v1575_v0 }
 0x107   :  { %1386 = vmatpush3.bf16.msra.mxu1 %v1529_v58  ;;  %1406 = vmatpush3.bf16.msra.mxu0 %v1530_v59  ;;  %v1574_v58 = vld [vmem:[%s1965_s3 + $0x1f8] sm:$0xff]  }
 0x108   :  { %1387 = vmatprep.subr.bf16.mxu1 %v1575_v0  ;;  %1407 = vmatprep.subr.bf16.mxu0 %v1575_v0  ;;  %v831_v59 = vld [vmem:[#allocation2 + $0x6] ss:$8 sm:$0xf] }
 0x10b   :  { %1388 = vmatpush3.bf16.msra.mxu1 %v1531_v60  ;;  %1408 = vmatpush3.bf16.msra.mxu0 %v1532_v61  ;;  %v944_v60 = vld [vmem:[#allocation2 + $0x7] ss:$8 sm:$0xf]  ;;  %v833_v61 = vor.u32 %v832_v55, %v831_v59 }
 0x10c   :  { %1389 = vmatprep.subr.bf16.mxu1 %v1575_v0  ;;  %1409 = vmatprep.subr.bf16.mxu0 %v1575_v0 }
 0x10f   :  { %1390 = vmatpush3.bf16.msra.mxu1 %v1533_v62  ;;  %1410 = vmatpush3.bf16.msra.mxu0 %v1534_v63  ;;  %v946_v62 = vor.u32 %v945_v56, %v944_v60  ;;  %v834_v63 = vpack.c.bf16 %v833_v61, %v833_v61 }
 0x110   :  { %1391 = vmatprep.subr.bf16.mxu1 %v1575_v0  ;;  %1411 = vmatprep.subr.bf16.mxu0 %v1575_v0 }
 0x113   :  { %1392 = vmatpush3.bf16.msra.mxu1 %v1535_v1  ;;  %1412 = vmatpush3.bf16.msra.mxu0 %v1536_v2  ;;  %v947_v1 = vpack.c.bf16 %v946_v62, %v946_v62  ;;  %v158_v2 = vld [vmem:[%s1968_s5] sm:$0x1f] }
 0x114   :  { %1393 = vmatprep.subr.bf16.mxu1 %v1575_v0  ;;  %1413 = vmatprep.subr.bf16.mxu0 %v1575_v0 }
 0x117   :  { %1394 = vmatpush3.bf16.msra.mxu1 %v1537_v3  ;;  %1414 = vmatpush3.bf16.msra.mxu0 %v1538_v4 }
 0x118   :  { %1395 = vmatprep.subr.bf16.mxu1 %v1575_v0  ;;  %1415 = vmatprep.subr.bf16.mxu0 %v1575_v0 }
 0x11b   :  { %1396 = vmatpush3.bf16.msra.mxu1 %v1539_v5  ;;  %1416 = vmatpush3.bf16.msra.mxu0 %v1540_v6 }
 0x11c   :  { %1397 = vmatprep.subr.bf16.mxu1 %v1575_v0  ;;  %1417 = vmatprep.subr.bf16.mxu0 %v1575_v0 }
 0x11f   :  { %1398 = vmatpush3.bf16.msra.mxu1 %v1541_v9  ;;  %1418 = vmatpush3.bf16.msra.mxu0 %v1542_v10 }
 0x120   :  { %1423 = vmatprep.subr.bf16.mxu1 %v1575_v0  ;;  %1443 = vmatprep.subr.bf16.mxu0 %v1575_v0 }
 0x122   :  { %1400 = vmatmul.mubr.bf16.vlgmr.msra.gmra.mrb[4].mxu1 %v382_v17  ;;  %1420 = vmatmul.mubr.bf16.vlgmr.msra.gmra.mrb[16].mxu0 %v495_v18 }
 0x123   :  { %1424 = vmatpush3.bf16.msra.mxu1 %v1543_v15  ;;  %1444 = vmatpush3.bf16.msra.mxu0 %v1544_v16 }
 0x124   :  { %1425 = vmatprep.subr.bf16.mxu1 %v1575_v0  ;;  %1445 = vmatprep.subr.bf16.mxu0 %v1575_v0 }
 0x125   :  { %1439 = vmatprep.mubr.msk.bf16.mxu1 %vm1576_vm0, %v1575_v0  ;;  %1459 = vmatprep.mubr.msk.bf16.mxu0 %vm1576_vm0, %v1575_v0 }
 0x127   :  { %1426 = vmatpush3.bf16.msra.mxu1 %v1545_v19  ;;  %1446 = vmatpush3.bf16.msra.mxu0 %v1546_v20 }
 0x128   :  { %1427 = vmatprep.subr.bf16.mxu1 %v1575_v0  ;;  %1447 = vmatprep.subr.bf16.mxu0 %v1575_v0 }
 0x12b   :  { %1428 = vmatpush3.bf16.msra.mxu1 %v1547_v21  ;;  %1448 = vmatpush3.bf16.msra.mxu0 %v1548_v22 }
 0x12c   :  { %1429 = vmatprep.subr.bf16.mxu1 %v1575_v0  ;;  %1449 = vmatprep.subr.bf16.mxu0 %v1575_v0 }
 0x12f   :  { %1430 = vmatpush3.bf16.msra.mxu1 %v1549_v23  ;;  %1450 = vmatpush3.bf16.msra.mxu0 %v1550_v24 }
 0x130   :  { %1431 = vmatprep.subr.bf16.mxu1 %v1575_v0  ;;  %1451 = vmatprep.subr.bf16.mxu0 %v1575_v0 }
 0x133   :  { %1432 = vmatpush3.bf16.msra.mxu1 %v1551_v25  ;;  %1452 = vmatpush3.bf16.msra.mxu0 %v1552_v26 }
 0x134   :  { %1433 = vmatprep.subr.bf16.mxu1 %v1575_v0  ;;  %1453 = vmatprep.subr.bf16.mxu0 %v1575_v0 }
 0x137   :  { %1434 = vmatpush3.bf16.msra.mxu1 %v1553_v27  ;;  %1454 = vmatpush3.bf16.msra.mxu0 %v1554_v28 }
 0x138   :  { %1435 = vmatprep.subr.bf16.mxu1 %v1575_v0  ;;  %1455 = vmatprep.subr.bf16.mxu0 %v1575_v0 }
 0x13b   :  { %1436 = vmatpush3.bf16.msra.mxu1 %v1555_v29  ;;  %1456 = vmatpush3.bf16.msra.mxu0 %v1556_v30 }
 0x13c   :  { %1437 = vmatprep.subr.bf16.mxu1 %v1575_v0  ;;  %1457 = vmatprep.subr.bf16.mxu0 %v1575_v0 }
 0x13f   :  { %1438 = vmatpush3.bf16.msra.mxu1 %v1557_v33  ;;  %1458 = vmatpush3.bf16.msra.mxu0 %v1558_v34 }
 0x140   :  { %1463 = vmatprep.subr.bf16.mxu1 %v1575_v0  ;;  %1483 = vmatprep.subr.bf16.mxu0 %v1575_v0 }
 0x142   :  { %1440 = vmatmul.mubr.bf16.vlgmr.msra.gmra.mrb[8].mxu1 %v608_v41  ;;  %1460 = vmatmul.mubr.bf16.vlgmr.msra.gmra.mrb[20].mxu0 %v721_v42 }
 0x143   :  { %1464 = vmatpush3.bf16.msra.mxu1 %v1559_v39  ;;  %1484 = vmatpush3.bf16.msra.mxu0 %v1560_v40 }
 0x144   :  { %1465 = vmatprep.subr.bf16.mxu1 %v1575_v0  ;;  %1485 = vmatprep.subr.bf16.mxu0 %v1575_v0 }
 0x145   :  { %1479 = vmatprep.mubr.msk.bf16.mxu1 %vm1576_vm0, %v1575_v0  ;;  %1499 = vmatprep.mubr.msk.bf16.mxu0 %vm1576_vm0, %v1575_v0 }
 0x147   :  { %1466 = vmatpush3.bf16.msra.mxu1 %v1561_v43  ;;  %1486 = vmatpush3.bf16.msra.mxu0 %v1562_v44 }
 0x148   :  { %1467 = vmatprep.subr.bf16.mxu1 %v1575_v0  ;;  %1487 = vmatprep.subr.bf16.mxu0 %v1575_v0 }
 0x14b   :  { %1468 = vmatpush3.bf16.msra.mxu1 %v1563_v45  ;;  %1488 = vmatpush3.bf16.msra.mxu0 %v1564_v46 }
 0x14c   :  { %1469 = vmatprep.subr.bf16.mxu1 %v1575_v0  ;;  %1489 = vmatprep.subr.bf16.mxu0 %v1575_v0 }
 0x14f   :  { %1470 = vmatpush3.bf16.msra.mxu1 %v1565_v47  ;;  %1490 = vmatpush3.bf16.msra.mxu0 %v1566_v48 }
 0x150   :  { %1471 = vmatprep.subr.bf16.mxu1 %v1575_v0  ;;  %1491 = vmatprep.subr.bf16.mxu0 %v1575_v0 }
 0x153   :  { %1472 = vmatpush3.bf16.msra.mxu1 %v1567_v49  ;;  %1492 = vmatpush3.bf16.msra.mxu0 %v1568_v50 }
 0x154   :  { %1473 = vmatprep.subr.bf16.mxu1 %v1575_v0  ;;  %1493 = vmatprep.subr.bf16.mxu0 %v1575_v0 }
 0x157   :  { %1474 = vmatpush3.bf16.msra.mxu1 %v1569_v51  ;;  %1494 = vmatpush3.bf16.msra.mxu0 %v1570_v52 }
 0x158   :  { %1475 = vmatprep.subr.bf16.mxu1 %v1575_v0  ;;  %1495 = vmatprep.subr.bf16.mxu0 %v1575_v0 }
 0x15b   :  { %1476 = vmatpush3.bf16.msra.mxu1 %v1571_v53  ;;  %1496 = vmatpush3.bf16.msra.mxu0 %v1572_v54 }
 0x15c   :  { %1477 = vmatprep.subr.bf16.mxu1 %v1575_v0  ;;  %1497 = vmatprep.subr.bf16.mxu0 %v1575_v0 }
 0x15f   :  { %1478 = vmatpush3.bf16.msra.mxu1 %v1573_v57  ;;  %1498 = vmatpush3.bf16.msra.mxu0 %v1574_v58 }
 0x162   :  { %1480 = vmatmul.mubr.bf16.vlgmr.msra.gmra.mrb[12].mxu1 %v834_v63  ;;  %1500 = vmatmul.mubr.bf16.vlgmr.msra.gmra.mrb[24].mxu0 %v947_v1 }
 0x1d5   :  { %v257_v3 = vpop.f32.mrb[0].mxu1  ;;  %v370_v4 = vpop.f32.mrb[12].mxu0 }
 0x1d6   :  { %v263_v5 = vadd.f32 %v257_v3, %v158_v2  ;;  %v1361_v6 = vpop.f32.mrb[1].mxu1  ;;  %v1381_v7 = vpop.f32.mrb[13].mxu0 }
 0x1d7   :  { %v260_v8 = vpop.f32.mrb[2].mxu1  ;;  %v373_v9 = vpop.f32.mrb[14].mxu0 }
 0x1d8   :  { %264 = vst [vmem:[%s1968_s5] sm:$0x1f] %v263_v5  ;;  %v1362_v0 = vpop.f32.mrb[3].mxu1  ;;  %v1382_v10 = vpop.f32.mrb[15].mxu0 }
 0x1df   :  { %v270_v11 = vld [vmem:[%s1968_s5] sm:$0x1f] }
 0x1e0   :  { %v376_v12 = vadd.f32 %v370_v4, %v270_v11 }
 0x1e2   :  { %377 = vst [vmem:[%s1968_s5] sm:$0x1f] %v376_v12 }
 0x1e9   :  { %v383_v13 = vld [vmem:[%s1968_s5] sm:$0x1f] }
 0x1f5   :  { %v483_v14 = vpop.f32.mrb[4].mxu1  ;;  %v596_v15 = vpop.f32.mrb[16].mxu0 }
 0x1f6   :  { %v489_v16 = vadd.f32 %v483_v14, %v383_v13  ;;  %v1401_v17 = vpop.f32.mrb[5].mxu1  ;;  %v1421_v18 = vpop.f32.mrb[17].mxu0 }
 0x1f7   :  { %v486_v19 = vpop.f32.mrb[6].mxu1  ;;  %v599_v20 = vpop.f32.mrb[18].mxu0 }
 0x1f8   :  { %490 = vst [vmem:[%s1968_s5] sm:$0x1f] %v489_v16  ;;  %v1402_v21 = vpop.f32.mrb[7].mxu1  ;;  %v1422_v22 = vpop.f32.mrb[19].mxu0 }
 0x1ff   :  { %v496_v23 = vld [vmem:[%s1968_s5] sm:$0x1f] }
 0x200   :  { %v602_v24 = vadd.f32 %v596_v15, %v496_v23 }
 0x202   :  { %603 = vst [vmem:[%s1968_s5] sm:$0x1f] %v602_v24 }
 0x209   :  { %v609_v25 = vld [vmem:[%s1968_s5] sm:$0x1f] }
 0x215   :  { %v709_v26 = vpop.f32.mrb[8].mxu1  ;;  %v822_v27 = vpop.f32.mrb[20].mxu0 }
 0x216   :  { %v715_v28 = vadd.f32 %v709_v26, %v609_v25  ;;  %v1441_v29 = vpop.f32.mrb[9].mxu1  ;;  %v1461_v30 = vpop.f32.mrb[21].mxu0 }
 0x217   :  { %v712_v31 = vpop.f32.mrb[10].mxu1  ;;  %v825_v32 = vpop.f32.mrb[22].mxu0 }
 0x218   :  { %716 = vst [vmem:[%s1968_s5] sm:$0x1f] %v715_v28  ;;  %v1442_v33 = vpop.f32.mrb[11].mxu1  ;;  %v1462_v34 = vpop.f32.mrb[23].mxu0 }
 0x21f   :  { %v722_v35 = vld [vmem:[%s1968_s5] sm:$0x1f] }
 0x220   :  { %v828_v36 = vadd.f32 %v822_v27, %v722_v35 }
 0x222   :  { %829 = vst [vmem:[%s1968_s5] sm:$0x1f] %v828_v36 }
 0x229   :  { %v835_v37 = vld [vmem:[%s1968_s5] sm:$0x1f] }
 0x235   :  { %v935_v38 = vpop.f32.mrb[12].mxu1  ;;  %v1048_v39 = vpop.f32.mrb[24].mxu0 }
 0x236   :  { %v941_v40 = vadd.f32 %v935_v38, %v835_v37  ;;  %v1481_v41 = vpop.f32.mrb[13].mxu1  ;;  %v1501_v42 = vpop.f32.mrb[25].mxu0 }
 0x237   :  { %v938_v43 = vpop.f32.mrb[14].mxu1  ;;  %v1051_v44 = vpop.f32.mrb[26].mxu0 }
 0x238   :  { %942 = vst [vmem:[%s1968_s5] sm:$0x1f] %v941_v40  ;;  %v1482_v45 = vpop.f32.mrb[15].mxu1  ;;  %v1502_v46 = vpop.f32.mrb[27].mxu0 }
 0x23f   :  { %v948_v47 = vld [vmem:[%s1968_s5] sm:$0x1f] }
 0x240   :  { %v1054_v48 = vadd.f32 %v1048_v39, %v948_v47 }
 0x242   :  { %1055 = vst [vmem:[%s1968_s5] sm:$0x1f] %v1054_v48 }

</bundles_post_ra>
